<compile_context>
chip_gen: v6e
topology: v6e:2x2x1
jax: 0.10.0
libtpu: 0.0.40
codegen_flags: <defaults>
</compile_context>

<pallas_src>
import math
import functools

import jax
import jax.numpy as jnp
from jax.experimental import pallas as pl
from jax.experimental.pallas import tpu as pltpu


# MXU input precision for all projections (accumulation is always f32).
# Set to jnp.float32 for a bit-closer match to the PyTorch f32 forward.
MXU_DTYPE = jnp.bfloat16


def _phys_vmem_bytes():
    """Best-effort physical-VMEM query; conservative (v7x, 64 MiB) fallback."""
    try:
        info = pltpu.get_tpu_info()
        cap = int(getattr(info, "vmem_capacity_bytes", 0) or 0)
        if cap > 0:
            return cap
    except Exception:
        pass
    return 64 * 1024 * 1024


_PHYS_VMEM = _phys_vmem_bytes()
if _PHYS_VMEM >= 128 * 1024 * 1024:
    # v5e / v6e: 128 MiB VMEM -> bigger K tiles, deeper scoped budget.
    VMEM_LIMIT = 96 * 1024 * 1024
    TM_PREF, TN_PREF, TK_PREF = 256, 256, 1024
else:
    # v7x (or unknown): 64 MiB physical VMEM -> conservative.
    VMEM_LIMIT = 48 * 1024 * 1024
    TM_PREF, TN_PREF, TK_PREF = 256, 256, 512

# Attention tile preferences (flash-style Tq / Tk tiling).
TQ_PREF, TKV_PREF = 256, 512


def _pick_tile(dim, preferred, align):
    """Largest `align`-aligned divisor of dim that is <= preferred; falls back
    to the full dim (always legal: block == full array dim)."""
    if dim <= preferred:
        return dim
    t = (preferred // align) * align
    while t >= align:
        if dim % t == 0:
            return t
        t -= align
    return dim


def _pick_tile_padded(dim, preferred, align):
    """Return (tile, padded_dim).  If no aligned divisor exists the dim is
    padded up to a tile multiple instead of falling back to one giant block."""
    if dim <= preferred:
        return dim, dim
    t = _pick_tile(dim, preferred, align)
    if t != dim:
        return t, dim
    t = max(align, (preferred // align) * align)
    return t, -(-dim // t) * t


# ----------------------------- Pallas kernels ------------------------------

def _linear_kernel(x_ref, w_ref, b_ref, o_ref, acc_ref, *, relu):
    """Tiled matmul; accumulator is initialized with the (broadcast) bias at
    k==0; optional ReLU and dtype cast at k==last."""
    @pl.when(pl.program_id(2) == 0)
    def _():
        acc_ref[...] = jnp.broadcast_to(b_ref[...], acc_ref.shape)

    acc_ref[...] += jnp.dot(x_ref[...].astype(MXU_DTYPE), w_ref[...],
                            preferred_element_type=jnp.float32)

    @pl.when(pl.program_id(2) == pl.num_programs(2) - 1)
    def _():
        y = acc_ref[...]
        if relu:
            y = jnp.maximum(y, 0.0)
        o_ref[...] = y.astype(o_ref.dtype)


def _linear_res_ln_kernel(x_ref, w_ref, b_ref, r_ref, g_ref, be_ref, o_ref,
                          acc_ref):
    """Fused LayerNorm(residual + x @ w + b) * gamma + beta, K-tiled with an
    f32 VMEM accumulator (grid = (M/tm, K/tk), K last / 'arbitrary')."""
    @pl.when(pl.program_id(1) == 0)
    def _():
        acc_ref[...] = jnp.broadcast_to(b_ref[...], acc_ref.shape)

    acc_ref[...] += jnp.dot(x_ref[...].astype(MXU_DTYPE), w_ref[...],
                            preferred_element_type=jnp.float32)

    @pl.when(pl.program_id(1) == pl.num_programs(1) - 1)
    def _():
        z = r_ref[...] + acc_ref[...]
        mean = jnp.mean(z, axis=-1, keepdims=True)
        var = jnp.mean(z * z, axis=-1, keepdims=True) - mean * mean
        o_ref[...] = ((z - mean) * jax.lax.rsqrt(var + 1e-5)
                      * g_ref[...] + be_ref[...])


def _mha_flash_kernel(*refs, scale, has_mask):
    """Flash-style attention over one (batch, Tq-tile) with an online softmax
    across Tk tiles; all heads handled by leading-batch einsums (no per-head
    lane slices, no concat of live per-head outputs)."""
    if has_mask:
        q_ref, k_ref, v_ref, mask_ref, o_ref, m_sc, l_sc, acc_sc = refs
    else:
        q_ref, k_ref, v_ref, o_ref, m_sc, l_sc, acc_sc = refs
        mask_ref = None

    ki = pl.program_id(2)

    @pl.when(ki == 0)
    def _():
        # -1e30 (not -inf) avoids inf-inf NaNs on fully-masked tiles.
        m_sc[...] = jnp.full(m_sc.shape, -1e30, jnp.float32)
        l_sc[...] = jnp.zeros(l_sc.shape, jnp.float32)
        acc_sc[...] = jnp.zeros(acc_sc.shape, jnp.float32)

    q = q_ref[0]          # (H, tq, dk)  bf16
    k = k_ref[0]          # (H, tk, dk)  bf16
    v = v_ref[0]          # (H, tk, dv)  bf16

    # Batched-over-heads QK^T on the MXU (canonical leading-batch dot_general).
    s = jnp.einsum('hqd,hkd->hqk', q, k,
                   preferred_element_type=jnp.float32) * scale
    if mask_ref is not None:
        s = s + mask_ref[...][None, :, :]

    m_prev = m_sc[...]                                    # (H, tq, 1)
    m_new = jnp.maximum(m_prev, jnp.max(s, axis=-1, keepdims=True))
    alpha = jnp.exp(m_prev - m_new)
    p = jnp.exp(s - m_new)                                # (H, tq, tk)
    l_sc[...] = alpha * l_sc[...] + jnp.sum(p, axis=-1, keepdims=True)
    acc_sc[...] = alpha * acc_sc[...] + jnp.einsum(
        'hqk,hkd->hqd', p.astype(v.dtype), v,
        preferred_element_type=jnp.float32)
    m_sc[...] = m_new

    @pl.when(ki == pl.num_programs(2) - 1)
    def _():
        inv = pl.reciprocal(l_sc[...], approx=True)       # EUP, off the VALU slot
        o_ref[0] = (acc_sc[...] * inv).astype(o_ref.dtype)


# ----------------------------- kernel wrappers ------------------------------

def linear(x, w, b, relu=False, out_dtype=jnp.float32):
    """x: (M, K), w: (K, N) MXU_DTYPE, b: (N,) f32 -> (M, N) out_dtype."""
    M, K = x.shape
    N = w.shape[1]
    tm, Mp = _pick_tile_padded(M, TM_PREF, 16)   # 16: bf16 sublane packing
    tn, Np = _pick_tile_padded(N, TN_PREF, 128)
    tk, Kp = _pick_tile_padded(K, TK_PREF, 128)
    if Mp != M or Kp != K:
        x = jnp.pad(x, ((0, Mp - M), (0, Kp - K)))
    if Kp != K or Np != N:
        w = jnp.pad(w, ((0, Kp - K), (0, Np - N)))
    b2 = b.reshape(1, N)
    if Np != N:
        b2 = jnp.pad(b2, ((0, 0), (0, Np - N)))

    kernel = functools.partial(_linear_kernel, relu=relu)
    out = pl.pallas_call(
        kernel,
        out_shape=jax.ShapeDtypeStruct((Mp, Np), out_dtype),
        grid=(Mp // tm, Np // tn, Kp // tk),
        in_specs=[pl.BlockSpec((tm, tk), lambda i, j, k: (i, k)),
                  pl.BlockSpec((tk, tn), lambda i, j, k: (k, j)),
                  pl.BlockSpec((1, tn), lambda i, j, k: (0, j))],
        out_specs=pl.BlockSpec((tm, tn), lambda i, j, k: (i, j)),
        scratch_shapes=[pltpu.VMEM((tm, tn), jnp.float32)],
        compiler_params=pltpu.CompilerParams(
            dimension_semantics=("parallel", "parallel", "arbitrary"),
            vmem_limit_bytes=VMEM_LIMIT),
    )(x, w, b2)
    if Mp != M or Np != N:
        out = out[:M, :N]
    return out


def linear_residual_layernorm(x, w, b, residual, gamma, beta):
    """LayerNorm(residual + x @ w + b) * gamma + beta, K-tiled.

    D (the LayerNorm axis) is kept whole per tile because the reduction needs
    the full row; K is pipelined so the (K, D) weight never fully resides in
    VMEM."""
    M, K = x.shape
    D = w.shape[1]
    tm, Mp = _pick_tile_padded(M, TM_PREF, 16)
    tk, Kp = _pick_tile_padded(K, TK_PREF, 128)
    if Mp != M or Kp != K:
        x = jnp.pad(x, ((0, Mp - M), (0, Kp - K)))
    if Kp != K:
        w = jnp.pad(w, ((0, Kp - K), (0, 0)))
    if Mp != M:
        residual = jnp.pad(residual, ((0, Mp - M), (0, 0)))

    out = pl.pallas_call(
        _linear_res_ln_kernel,
        out_shape=jax.ShapeDtypeStruct((Mp, D), jnp.float32),
        grid=(Mp // tm, Kp // tk),
        in_specs=[pl.BlockSpec((tm, tk), lambda i, k: (i, k)),
                  pl.BlockSpec((tk, D), lambda i, k: (k, 0)),
                  pl.BlockSpec((1, D), lambda i, k: (0, 0)),
                  pl.BlockSpec((tm, D), lambda i, k: (i, 0)),
                  pl.BlockSpec((1, D), lambda i, k: (0, 0)),
                  pl.BlockSpec((1, D), lambda i, k: (0, 0))],
        out_specs=pl.BlockSpec((tm, D), lambda i, k: (i, 0)),
        scratch_shapes=[pltpu.VMEM((tm, D), jnp.float32)],
        compiler_params=pltpu.CompilerParams(
            dimension_semantics=("parallel", "arbitrary"),
            vmem_limit_bytes=VMEM_LIMIT),
    )(x, w, b.reshape(1, D), residual, gamma.reshape(1, D),
      beta.reshape(1, D))
    if Mp != M:
        out = out[:M]
    return out


def attention(q, k, v, mask, scale, out_dtype):
    """q: (B, H, Tq, dk), k: (B, H, Tk, dk), v: (B, H, Tk, dv) head-leading;
    mask: (Tq, Tk) additive or None.  Flash-style grid (B, Tq/tq, Tk/tk)."""
    B, H, Tq, dk = q.shape
    _, _, Tk, dv = v.shape
    tq = _pick_tile(Tq, TQ_PREF, 8)
    tk = _pick_tile(Tk, TKV_PREF, 128)   # 128-aligned keeps the mask block legal
    has_mask = mask is not None

    kernel = functools.partial(_mha_flash_kernel, scale=scale,
                               has_mask=has_mask)
    in_specs = [pl.BlockSpec((1, H, tq, dk), lambda b, qi, ki: (b, 0, qi, 0)),
                pl.BlockSpec((1, H, tk, dk), lambda b, qi, ki: (b, 0, ki, 0)),
                pl.BlockSpec((1, H, tk, dv), lambda b, qi, ki: (b, 0, ki, 0))]
    args = [q, k, v]
    if has_mask:
        in_specs.append(pl.BlockSpec((tq, tk), lambda b, qi, ki: (qi, ki)))
        args.append(mask)

    return pl.pallas_call(
        kernel,
        out_shape=jax.ShapeDtypeStruct((B, H, Tq, dv), out_dtype),
        grid=(B, Tq // tq, Tk // tk),
        in_specs=in_specs,
        out_specs=pl.BlockSpec((1, H, tq, dv), lambda b, qi, ki: (b, 0, qi, 0)),
        scratch_shapes=[pltpu.VMEM((H, tq, 1), jnp.float32),
                        pltpu.VMEM((H, tq, 1), jnp.float32),
                        pltpu.VMEM((H, tq, dv), jnp.float32)],
        compiler_params=pltpu.CompilerParams(
            dimension_semantics=("parallel", "parallel", "arbitrary"),
            vmem_limit_bytes=VMEM_LIMIT),
    )(*args)


# ----------------------------- model pieces ------------------------------

def multi_head_attention(p, input_kv, input_q, num_heads, mask=None):
    """Matches the PyTorch module: Q from input2 (=input_q), K/V from input1
    (=input_kv).  Returns the head-concat context (Bq*Tq, vdim) in MXU_DTYPE;
    the output projection (self.fc) is fused into the caller's
    residual+LayerNorm kernel."""
    Bkv, Tkv, D = input_kv.shape
    Bq, Tq, _ = input_q.shape
    kdim = p["w_q"].shape[1]
    vdim = p["w_kv"].shape[1] - kdim
    dk = kdim // num_heads
    dv = vdim // num_heads

    if input_kv is input_q:
        # Self-attention: single fused QKV projection, bf16 output (pure-MXU consumer).
        qkv = linear(input_q.reshape(Bq * Tq, D), p["w_qkv"], p["b_qkv"],
                     out_dtype=MXU_DTYPE)
        q2, k2, v2 = qkv[:, :kdim], qkv[:, kdim:2 * kdim], qkv[:, 2 * kdim:]
        Bk, Tk = Bq, Tq
    else:
        # Cross-attention: Q on the query stream, fused K|V on the key/value stream.
        q2 = linear(input_q.reshape(Bq * Tq, D), p["w_q"], p["b_q"],
                    out_dtype=MXU_DTYPE)
        kv = linear(input_kv.reshape(Bkv * Tkv, D), p["w_kv"], p["b_kv"],
                    out_dtype=MXU_DTYPE)
        k2, v2 = kv[:, :kdim], kv[:, kdim:]
        Bk, Tk = Bkv, Tkv

    # Head split + permute(0,2,1,3): cheap bf16 bandwidth-bound XLA transposes
    # that give the kernel canonical head-leading blocks.
    # TODO(synk): fold the head transpose into the attention kernel once
    # non-leading-batch dot_general lowering is verified on Mosaic.
    q4 = q2.reshape(Bq, Tq, num_heads, dk).transpose(0, 2, 1, 3)
    k4 = k2.reshape(Bk, Tk, num_heads, dk).transpose(0, 2, 1, 3)
    v4 = v2.reshape(Bk, Tk, num_heads, dv).transpose(0, 2, 1, 3)

    mask_add = None if mask is None else mask[:Tq].astype(jnp.float32)  # mirrors mask[:num_tokens2]
    ctx = attention(q4, k4, v4, mask_add, 1.0 / math.sqrt(dk),
                    out_dtype=MXU_DTYPE)                   # (B, H, Tq, dv)
    # permute(0,2,1,3).reshape — identical to the PyTorch reference.
    return ctx.transpose(0, 2, 1, 3).reshape(Bq * Tq, num_heads * dv)


def encoder_layer(p, x, num_heads, mask):
    B, T, D = x.shape
    x2d = x.reshape(B * T, D)
    # self-attention -> fused (output proj + residual + LayerNorm)
    a = multi_head_attention(p["mha"], x, x, num_heads, mask)
    x2d = linear_residual_layernorm(a, p["mha"]["w_o"], p["mha"]["b_o"],
                                    x2d, p["ln_g"], p["ln_b"])
    # feed-forward: fused(linear+bias+ReLU, bf16 out) -> fused(linear + residual + LN)
    # TODO(synk): nn.Dropout between ReLU and the second Linear is identity (eval mode).
    h = linear(x2d, p["ff"]["w1"], p["ff"]["b1"], relu=True,
               out_dtype=MXU_DTYPE)
    x2d = linear_residual_layernorm(h, p["ff"]["w2"], p["ff"]["b2"],
                                    x2d, p["ln_g"], p["ln_b"])
    return x2d.reshape(B, T, D)


def decoder_layer(p, y, enc, num_heads, mask):
    B, T, D = y.shape
    y2d = y.reshape(B * T, D)
    # masked self-attention
    a = multi_head_attention(p["self_mha"], y, y, num_heads, mask)
    y2d = linear_residual_layernorm(a, p["self_mha"]["w_o"], p["self_mha"]["b_o"],
                                    y2d, p["ln_g"], p["ln_b"])
    # cross-attention (Q from decoder, K/V from encoder, no mask)
    y3d = y2d.reshape(B, T, D)
    a = multi_head_attention(p["cross_mha"], enc, y3d, num_heads, None)
    y2d = linear_residual_layernorm(a, p["cross_mha"]["w_o"], p["cross_mha"]["b_o"],
                                    y2d, p["ln_g"], p["ln_b"])
    # feed-forward
    h = linear(y2d, p["ff"]["w1"], p["ff"]["b1"], relu=True,
               out_dtype=MXU_DTYPE)
    y2d = linear_residual_layernorm(h, p["ff"]["w2"], p["ff"]["b2"],
                                    y2d, p["ln_g"], p["ln_b"])
    return y2d.reshape(B, T, D)


def transformer_forward(params, source, target, encoder_mask=None, decoder_mask=None):
    D = params["main_dim"]
    H = params["num_heads"]
    emb = params["embedding"]
    pe = params["pos_enc"]

    # Embedding gather + positional encoding left to XLA (no Pallas win here).
    x = emb[source] * math.sqrt(D)            # (B, Ts, D)
    y = emb[target] * math.sqrt(D)            # (B, Tt, D)
    x = (x + pe[: x.shape[1]]).astype(jnp.float32)
    y = (y + pe[: y.shape[1]]).astype(jnp.float32)

    for lp in params["encoder"]:
        x = encoder_layer(lp, x, H, encoder_mask)
    for lp in params["decoder"]:
        y = decoder_layer(lp, y, x, H, decoder_mask)

    B, T, _ = y.shape
    out = linear(y.reshape(B * T, D), params["fc_w"], params["fc_b"])
    return out.reshape(B, T, params["fc_w"].shape[1])


# ----------------------------- parameter init ------------------------------

def _init_linear(key, din, dout):
    k1, k2 = jax.random.split(key)
    bound = 1.0 / math.sqrt(din)
    w = jax.random.uniform(k1, (din, dout), jnp.float32, -bound, bound)
    b = jax.random.uniform(k2, (dout,), jnp.float32, -bound, bound)
    return w, b


def _init_mha(key, main_dim, k_dim=None, v_dim=None):
    k_dim = main_dim if k_dim is None else k_dim
    v_dim = main_dim if v_dim is None else v_dim
    ks = jax.random.split(key, 4)
    wq, bq = _init_linear(ks[0], main_dim, k_dim)
    wk, bk = _init_linear(ks[1], main_dim, k_dim)
    wv, bv = _init_linear(ks[2], main_dim, v_dim)
    wo, bo = _init_linear(ks[3], v_dim, main_dim)
    return dict(
        # fused Q|K|V (self-attention) and K|V (cross-attention) projections
        w_qkv=jnp.concatenate([wq, wk, wv], axis=1).astype(MXU_DTYPE),
        b_qkv=jnp.concatenate([bq, bk, bv]),
        w_q=wq.astype(MXU_DTYPE), b_q=bq,
        w_kv=jnp.concatenate([wk, wv], axis=1).astype(MXU_DTYPE),
        b_kv=jnp.concatenate([bk, bv]),
        w_o=wo.astype(MXU_DTYPE), b_o=bo,
    )


def _init_ff(key, main_dim, ff_dim):
    k1, k2 = jax.random.split(key)
    w1, b1 = _init_linear(k1, main_dim, ff_dim)
    w2, b2 = _init_linear(k2, ff_dim, main_dim)
    return dict(w1=w1.astype(MXU_DTYPE), b1=b1,
                w2=w2.astype(MXU_DTYPE), b2=b2)


def _positional_encoding(max_tokens, main_dim):
    # Matches the PyTorch reference (base 100, sin on even / cos on odd dims).
    i = jnp.arange(max_tokens, dtype=jnp.float32)[:, None]
    j = jnp.arange(main_dim)[None, :]
    denom = 100.0 ** (2.0 * (j // 2).astype(jnp.float32) / main_dim)
    angle = i / denom
    return jnp.where(j % 2 == 0, jnp.sin(angle), jnp.cos(angle)).astype(jnp.float32)


def init_transformer(key, num_input_tokens, main_dim, ff_dim, num_heads,
                     num_encoder_layers, num_decoder_layers, max_tokens=100,
                     num_output_tokens=None):
    num_output_tokens = num_input_tokens if num_output_tokens is None else num_output_tokens
    keys = jax.random.split(key, 2 + num_encoder_layers + num_decoder_layers)
    params = {
        "main_dim": main_dim,
        "num_heads": num_heads,
        "embedding": jax.random.normal(keys[0], (num_input_tokens, main_dim), jnp.float32),
        "pos_enc": _positional_encoding(max_tokens, main_dim),
        "encoder": [],
        "decoder": [],
    }
    for l in range(num_encoder_layers):
        k1, k2 = jax.random.split(keys[2 + l])
        # One shared LayerNorm per layer, reused for every norm in that layer
        # (matches the PyTorch module's single `self.norm`).
        params["encoder"].append(dict(
            mha=_init_mha(k1, main_dim),
            ff=_init_ff(k2, main_dim, ff_dim),
            ln_g=jnp.ones((main_dim,), jnp.float32),
            ln_b=jnp.zeros((main_dim,), jnp.float32),
        ))
    for l in range(num_decoder_layers):
        k1, k2, k3 = jax.random.split(keys[2 + num_encoder_layers + l], 3)
        params["decoder"].append(dict(
            self_mha=_init_mha(k1, main_dim),
            cross_mha=_init_mha(k2, main_dim),
            ff=_init_ff(k3, main_dim, ff_dim),
            ln_g=jnp.ones((main_dim,), jnp.float32),
            ln_b=jnp.zeros((main_dim,), jnp.float32),
        ))
    fc_w, fc_b = _init_linear(keys[1], main_dim, num_output_tokens)
    params["fc_w"], params["fc_b"] = fc_w.astype(MXU_DTYPE), fc_b
    return params


# ----------------------------- main ------------------------------

if __name__ == "__main__":
    VOCAB, MAIN_DIM, FF_DIM, HEADS = 16, 32, 64, 4
    N_ENC, N_DEC = 2, 2
    B, T_SRC, T_TGT = 2, 8, 8

    root = jax.random.PRNGKey(0)
    k_params, k_src, k_tgt = jax.random.split(root, 3)

    params = init_transformer(k_params, VOCAB, MAIN_DIM, FF_DIM, HEADS,
                              N_ENC, N_DEC, max_tokens=100)

    source = jax.random.randint(k_src, (B, T_SRC), 0, VOCAB)
    target = jax.random.randint(k_tgt, (B, T_TGT), 0, VOCAB)

    # causal additive mask for decoder self-attention (0 allowed, -1e9 blocked)
    causal = jnp.where(jnp.tril(jnp.ones((T_TGT, T_TGT), bool)), 0.0, -1e9).astype(jnp.float32)

    out = transformer_forward(params, source, target,
                              encoder_mask=None, decoder_mask=causal)
    jax.block_until_ready(out)
    assert out.shape == (B, T_TGT, VOCAB)
    assert bool(jnp.all(jnp.isfinite(out)))
    print("KERNEL_OK")
</pallas_src>

<mosaic_0001>
module attributes {stable_mosaic.version = 11 : i64} {
  func.func @_linear_kernel(%arg0: i32, %arg1: i32, %arg2: i32, %arg3: memref<16x32xf32, #tpu.memory_space<vmem>>, %arg4: memref<32x96xbf16, #tpu.memory_space<vmem>>, %arg5: memref<1x96xf32, #tpu.memory_space<vmem>>, %arg6: memref<16x96xbf16, #tpu.memory_space<vmem>>, %arg7: memref<16x96xf32, #tpu.memory_space<vmem>>) attributes {dimension_semantics = [#tpu.dimension_semantics<parallel>, #tpu.dimension_semantics<parallel>, #tpu.dimension_semantics<arbitrary>], iteration_bounds = array<i64: 1, 1, 1>, scalar_prefetch = 0 : i64, scratch_operands = 1 : i64, tpu.core_type = #tpu.core_type<tc>, window_params = [{transform_indices = @transform_0, window_bounds = array<i64: 16, 32>}, {transform_indices = @transform_1, window_bounds = array<i64: 32, 96>}, {transform_indices = @transform_2, window_bounds = array<i64: 1, 96>}, {transform_indices = @transform_3, window_bounds = array<i64: 16, 96>}]} {
    %c0_i32 = arith.constant 0 : i32
    %0 = arith.cmpi eq, %arg2, %c0_i32 : i32
    %1 = arith.extui %0 : i1 to i32
    %c0_i32_0 = arith.constant 0 : i32
    %2 = arith.cmpi ne, %1, %c0_i32_0 : i32
    scf.if %2 {
      %c0_10 = arith.constant 0 : index
      %c0_11 = arith.constant 0 : index
      %13 = vector.load %arg5[%c0_10, %c0_11] : memref<1x96xf32, #tpu.memory_space<vmem>>, vector<1x96xf32>
      %14 = vector.shape_cast %13 : vector<1x96xf32> to vector<1x96xf32>
      %15 = vector.broadcast %14 : vector<1x96xf32> to vector<16x96xf32>
      %c0_12 = arith.constant 0 : index
      %c0_13 = arith.constant 0 : index
      %16 = vector.load %arg7[%c0_12, %c0_13] : memref<16x96xf32, #tpu.memory_space<vmem>>, vector<16x96xf32>
      tpu.vector_store %arg7[%c0_12, %c0_13], %15 {strides = array<i32>} : memref<16x96xf32, #tpu.memory_space<vmem>>, vector<16x96xf32>,
    } else {
    }
    %c0 = arith.constant 0 : index
    %c0_1 = arith.constant 0 : index
    %3 = vector.load %arg7[%c0, %c0_1] : memref<16x96xf32, #tpu.memory_space<vmem>>, vector<16x96xf32>
    %c0_2 = arith.constant 0 : index
    %c0_3 = arith.constant 0 : index
    %4 = vector.load %arg3[%c0_2, %c0_3] : memref<16x32xf32, #tpu.memory_space<vmem>>, vector<16x32xf32>
    %5 = arith.truncf %4 : vector<16x32xf32> to vector<16x32xbf16>
    %c0_4 = arith.constant 0 : index
    %c0_5 = arith.constant 0 : index
    %6 = vector.load %arg4[%c0_4, %c0_5] : memref<32x96xbf16, #tpu.memory_space<vmem>>, vector<32x96xbf16>
    %cst = arith.constant dense<0.000000e+00> : vector<16x96xf32>
    %7 = tpu.matmul %5, %6, %cst {dimension_numbers = #tpu.dot_dimension_numbers<[1], [0], [0], [1], [0, 0, 1, 1], [], []>} : vector<16x32xbf16>, vector<32x96xbf16>, vector<16x96xf32> -> vector<16x96xf32>
    %8 = arith.addf %3, %7 : vector<16x96xf32>
    %c0_6 = arith.constant 0 : index
    %c0_7 = arith.constant 0 : index
    %9 = vector.load %arg7[%c0_6, %c0_7] : memref<16x96xf32, #tpu.memory_space<vmem>>, vector<16x96xf32>
    tpu.vector_store %arg7[%c0_6, %c0_7], %8 {strides = array<i32>} : memref<16x96xf32, #tpu.memory_space<vmem>>, vector<16x96xf32>,
    %c0_i32_8 = arith.constant 0 : i32
    %10 = arith.cmpi eq, %arg2, %c0_i32_8 : i32
    %11 = arith.extui %10 : i1 to i32
    %c0_i32_9 = arith.constant 0 : i32
    %12 = arith.cmpi ne, %11, %c0_i32_9 : i32
    scf.if %12 {
      %c0_10 = arith.constant 0 : index
      %c0_11 = arith.constant 0 : index
      %13 = vector.load %arg7[%c0_10, %c0_11] : memref<16x96xf32, #tpu.memory_space<vmem>>, vector<16x96xf32>
      %14 = arith.truncf %13 : vector<16x96xf32> to vector<16x96xbf16>
      %c0_12 = arith.constant 0 : index
      %c0_13 = arith.constant 0 : index
      %15 = vector.load %arg6[%c0_12, %c0_13] : memref<16x96xbf16, #tpu.memory_space<vmem>>, vector<16x96xbf16>
      tpu.vector_store %arg6[%c0_12, %c0_13], %14 {strides = array<i32>} : memref<16x96xbf16, #tpu.memory_space<vmem>>, vector<16x96xbf16>,
    } else {
    }
    return
  }
  func.func @transform_0(%arg0: i32, %arg1: i32, %arg2: i32) -> (i32, i32) {
    %c0_i32 = arith.constant 0 : i32
    return %arg0, %arg2 : i32, i32
  }
  func.func @transform_1(%arg0: i32, %arg1: i32, %arg2: i32) -> (i32, i32) {
    %c0_i32 = arith.constant 0 : i32
    return %arg2, %arg1 : i32, i32
  }
  func.func @transform_2(%arg0: i32, %arg1: i32, %arg2: i32) -> (i32, i32) {
    %c0_i32 = arith.constant 0 : i32
    %c0_i32_0 = arith.constant 0 : i32
    return %c0_i32, %arg1 : i32, i32
  }
  func.func @transform_3(%arg0: i32, %arg1: i32, %arg2: i32) -> (i32, i32) {
    %c0_i32 = arith.constant 0 : i32
    return %arg0, %arg1 : i32, i32
  }
}

</mosaic_0001>

<bundles_post_ra>
// kernel: tpu_custom_call.1
= control target key start
LH: loop header
LB: loop body
LE: loop exit
PB: predicated region body
PF: predicated region fallthrough
CT: control target
= control target key end

     0   :  { %8 = vsyncpa [#allocation4], 0  ;;  %s310_s0 = inlined_call_operand.hbm [shape: f32[16,32], index: 0, kind: input, shape index: {}]   ;;  %s311_s1 = inlined_call_operand.hbm [shape: bf16[32,96], index: 1, kind: input, shape index: {}]   ;;  %s312_s2 = inlined_call_operand.vmem [shape: f32[1,96], index: 2, kind: input, shape index: {}]   ;;  %s313_s3 = inlined_call_operand.hbm [shape: bf16[16,96], index: 3, kind: output, shape index: {}]  }
   0x1   :  { %9 = vsyncpa [#allocation7], 0 }
   0x2   :  { %10 = vsyncpa [#allocation5], 0  ;;  %s259_s12 = smov [#allocation3]  }
   0x3   :  { %s16_s13 = sshll.u32 %s259_s12, 4  ;;  %s17_s13 = int_to_ptr.vmem [resolvable:$true] %s16_s13 }
   0x4   :  { %s201_s14 = scalar_lea.vmem %s17_s13, 256  ;;  %p206_p1 = scmp.lt.s32.totalorder %s17_s13, %s17_s13 }
   0x5   :  { %p202_p0 = scmp.ne.s32.totalorder %s17_s13, %s201_s14  ;;  %p207_p2 = scmp.lt.s32.totalorder %s201_s14, %s201_s14 }
   0x7   :  { %p208_p3 = por %p207_p2, %p206_p1 }
   0x9   :  { %p209_p4 = pnand %p208_p3, %p202_p0 }
   0xb   :  { %212 = shalt.err (!%p209_p4)
}
   0xc   :  { %s260_s15 = smov 128   ;;  %s261_s16 = smov 8  }
   0xd   :  { %22 = dma.hbm_to_vmem [thread:$0]  %s310_s0, 256, %s17_s13, [#allocation4], %s260_s15, %s260_s15, %s261_s16  }
   0xe   :  { %s262_s19 = smov [#allocation6]  }
   0xf   :  { %s28_s20 = sshll.u32 %s262_s19, 4  ;;  %s29_s20 = int_to_ptr.vmem [resolvable:$true] %s28_s20 }
  0x10   :  { %s221_s21 = scalar_lea.vmem %s29_s20, 256  ;;  %p226_p6 = scmp.lt.s32.totalorder %s29_s20, %s29_s20 }
  0x11   :  { %p222_p5 = scmp.ne.s32.totalorder %s29_s20, %s221_s21  ;;  %p227_p7 = scmp.lt.s32.totalorder %s221_s21, %s221_s21 }
  0x13   :  { %p228_p8 = por %p227_p7, %p226_p6 }
  0x15   :  { %p229_p9 = pnand %p228_p8, %p222_p5 }
  0x17   :  { %232 = shalt.err (!%p229_p9)
}
  0x18   :  { %s263_s22 = smov 64   ;;  %s264_s23 = smov 4  }
  0x19   :  { %34 = dma.hbm_to_vmem [thread:$0]  %s311_s1, 256, %s29_s20, [#allocation7], %s263_s22, %s263_s22, %s264_s23  }
  0x1a   :  { %253 = dma.done.wait [#allocation4], 256  }
  0x1b   :  { %254 = vsyncadd [#allocation4], 4294967040 }
  0x1c   :  { %255 = dma.done.wait [#allocation7], 256  }
  0x1d   :  { %256 = vsyncadd [#allocation7], 4294967040  ;;  %v265_v0 = vmov 0.0   ;;  %vm266_vm0 = vmmov 0   ;;  %v191_v1 = vld [vmem:[#allocation6 + $0x8] sm:$0xff]   ;;  %vm55_vm1 = vcmask 785408  }
  0x1e   :  { %174 = vmatprep.subr.bf16.mxu0 %v265_v0  ;;  %178 = vmatprep.mubr.msk.bf16.mxu0 %vm266_vm0, %v265_v0  ;;  %v192_v2 = vld [vmem:[#allocation6] sm:$0xff]   ;;  %v60_v3 = vld [vmem:[#allocation3] sm:$0xff]  ;;  %v61_v4 = vld [vmem:[#allocation3 + $0x8] sm:$0xff]  ;;  %vm79_vm2 = vcmask 261120   ;;  %vm142_vm3 = vcmask 781312   ;;  %s267_s1 = smov [#allocation8]  }
  0x1f   :  { %175 = vmatpush3.bf16.msra.mxu0 %v191_v1  ;;  %v163_v5 = vld [vmem:[%s312_s2] ss:$0 sm:$0xff]  ;;  %v62_v6 = vpack.c.bf16 %v61_v4, %v60_v3  ;;  %s150_s2 = sshll.u32 %s267_s1, 4  ;;  %s151_s2 = int_to_ptr.vmem [resolvable:$true] %s150_s2 }
  0x20   :  { %176 = vmatprep.subr.bf16.mxu0 %v265_v0  ;;  %56 = vst.msk [vmem:[#allocation2] sm:$0xff] %vm55_vm1, %v163_v5  ;;  %57 = vst.msk [vmem:[#allocation2 + $0x8] sm:$0xff] %vm55_vm1, %v163_v5  ;;  %s233_s27 = scalar_lea.vmem %s151_s2, 128  ;;  %p238_p11 = scmp.lt.s32.totalorder %s151_s2, %s151_s2 }
  0x21   :  { %p234_p10 = scmp.ne.s32.totalorder %s151_s2, %s233_s27  ;;  %p239_p12 = scmp.lt.s32.totalorder %s233_s27, %s233_s27 }
  0x23   :  { %177 = vmatpush3.bf16.msra.mxu0 %v192_v2  ;;  %p240_p13 = por %p239_p12, %p238_p11 }
  0x25   :  { %p241_p0 = pnand %p240_p13, %p234_p10 }
  0x26   :  { %179 = vmatmul.mubr.msk.bf16.vlgmr.msra.gmra.mxu0 %vm79_vm2, %v62_v6 }
  0x27   :  { %v58_v7 = vld [vmem:[#allocation2] sm:$0xff]  ;;  %v59_v11 = vld [vmem:[#allocation2 + $0x8] sm:$0xff] }
  0xe6   :  { %v117_v8 = vpop.f32.mrf.mxu0 }
  0xe7   :  { %v124_v9 = vadd.f32 %v117_v8, %v58_v7 }
  0xe8   :  { %v180_v10 = vpop.f32.mrf.mxu0 }
  0xe9   :  { %127 = vst.msk [vmem:[#allocation2] sm:$0xff] %vm55_vm1, %v124_v9 }
  0xea   :  { %v120_v12 = vpop.f32.mrf.mxu0 }
  0xeb   :  { %v125_v13 = vadd.f32 %v120_v12, %v59_v11 }
  0xec   :  { %v181_v14 = vpop.f32.mrf.mxu0 }
  0xed   :  { %128 = vst.msk [vmem:[#allocation2 + $0x8] sm:$0xff] %vm55_vm1, %v125_v13 }
  0xf0   :  { %v132_v15 = vld [vmem:[#allocation2] sm:$0xff] }
  0xf1   :  { %v169_v16 = vpack.c.bf16 %v132_v15, %v132_v15 }
  0xf3   :  { %143 = vst.msk [vmem:[#allocation8] sm:$0xf] %vm142_vm3, %v169_v16 }
  0xf4   :  { %v133_v17 = vld [vmem:[#allocation2 + $0x8] sm:$0xff] }
  0xf5   :  { %v170_v18 = vpack.c.bf16 %v133_v17, %v133_v17 }
  0xf7   :  { %144 = vst.msk [vmem:[#allocation8 + $0x4] sm:$0xf] %vm142_vm3, %v170_v18 }
  0xf8   :  { %244 = shalt.err (!%p241_p0)
}
  0xf9   :  { %156 = dma.vmem_to_hbm [thread:$0]  %s151_s2, 128, %s313_s3, [#allocation5], %s263_s22, %s263_s22, %s264_s23  }
  0xfa   :  { %257 = dma.done.wait [#allocation5], 128  }
  0xfb   :  { %258 = vsyncadd [#allocation5], 4294967168 }
  0xfc   :  { %160 = vsyncpa [#allocation4], 1 }
  0xfd   :  { %161 = vsyncpa [#allocation7], 1 }
  0xfe   :  { %162 = vsyncpa [#allocation5], 1 }

</bundles_post_ra>
